<compile_context>
chip_gen: v6e
topology: v6e:2x2x1
jax: 0.10.0
libtpu: 0.0.40
codegen_flags: <defaults>
</compile_context>

<pallas_src>
import numpy as np
import jax
import jax.numpy as jnp
from jax.experimental import pallas as pl
from jax.experimental.pallas import tpu as pltpu


_MAX_INFLIGHT_DMAS = 8  # ring depth; plenty to hide DMA issue latency


def _make_dma_gather_kernel(n_copies: int, nsem: int):
    """Kernel factory: copy `n_copies` time slices via a ring of `nsem` DMAs."""
    n_prime = min(nsem, n_copies)

    def kernel(sec_ref, x_ref, o_ref, sems):
        # sec_ref: SMEM int32[T_remain]   (scalar prefetch)
        # x_ref:   HBM  [B, T, F]         (memory_space=ANY, raw ref)
        # o_ref:   HBM  [B, T_remain, F]  (memory_space=ANY, raw ref)
        # sems:    DMA semaphores [nsem]

        def start_copy(t, slot):
            # One strided HBM->HBM DMA per kept timestep: all B batch rows at
            # once (B runs of F contiguous elements). No VMEM round trip.
            src_t = sec_ref[t]
            pltpu.make_async_copy(
                x_ref.at[:, pl.ds(src_t, 1), :],
                o_ref.at[:, pl.ds(t, 1), :],
                sems.at[slot],
            ).start()

        def wait_slot(slot):
            # All copies have identical byte size, so a fixed-index descriptor
            # is a valid wait handle for any copy signaled on this slot.
            pltpu.make_async_copy(
                x_ref.at[:, pl.ds(0, 1), :],
                o_ref.at[:, pl.ds(0, 1), :],
                sems.at[slot],
            ).wait()

        # Prime the ring (static unroll; n_prime <= nsem is small).
        for t in range(n_prime):
            start_copy(t, t % nsem)

        # Steady state: free a slot (wait on the copy issued nsem steps ago),
        # then immediately reuse it for the next timestep.
        @pl.loop(n_prime, n_copies)
        def _(t):
            slot = t % nsem
            wait_slot(slot)
            start_copy(t, slot)

        # Drain the final in-flight copies (their slots are distinct because
        # n_prime <= nsem and the last n_prime step indices are consecutive).
        for j in range(n_prime):
            wait_slot((n_copies - n_prime + j) % nsem)

    return kernel


def _temporal_gather(x3: jnp.ndarray, sec_list: jnp.ndarray) -> jnp.ndarray:
    """Gather time slices of x3[B, T, F] at indices sec_list -> [B, T_remain, F]."""
    B, T, F = x3.shape
    T_remain = int(sec_list.shape[0])
    nsem = max(1, min(_MAX_INFLIGHT_DMAS, T_remain))

    kernel = _make_dma_gather_kernel(T_remain, nsem)

    return pl.pallas_call(
        kernel,
        out_shape=jax.ShapeDtypeStruct((B, T_remain, F), x3.dtype),
        grid_spec=pltpu.PrefetchScalarGridSpec(
            num_scalar_prefetch=1,          # sec_list -> SMEM
            grid=(1,),                      # single invocation; DMAs pipeline themselves
            in_specs=[pl.BlockSpec(memory_space=pl.ANY)],   # raw HBM ref, no auto-DMA
            out_specs=pl.BlockSpec(memory_space=pl.ANY),    # written via manual DMAs
            scratch_shapes=[pltpu.SemaphoreType.DMA((nsem,))],
        ),
        compiler_params=pltpu.CompilerParams(
            dimension_semantics=("arbitrary",),
        ),
    )(sec_list, x3)


def random_temporal_delete(x_seq: jnp.ndarray, T_remain: int, batch_first: bool,
                           key: jax.Array) -> jnp.ndarray:
    """JAX/Pallas equivalent of spikingjelly.datasets.random_temporal_delete."""
    if batch_first:
        N, T = x_seq.shape[0], x_seq.shape[1]
        rest = x_seq.shape[2:]
        F = int(np.prod(rest)) if len(rest) else 1
        x3 = x_seq.reshape(N, T, F)
    else:
        T = x_seq.shape[0]
        rest = x_seq.shape[1:]
        F = int(np.prod(rest)) if len(rest) else 1
        x3 = x_seq.reshape(1, T, F)

    # Uniform draw of T_remain distinct indices, sorted (same distribution as
    # np.random.choice(replace=False)+sort; not bit-identical RNG to torch/numpy).
    sec_list = jnp.sort(
        jax.random.choice(key, T, shape=(T_remain,), replace=False)
    ).astype(jnp.int32)

    out3 = _temporal_gather(x3, sec_list)

    if batch_first:
        return out3.reshape((N, T_remain) + tuple(rest))
    else:
        return out3.reshape((T_remain,) + tuple(rest))


class RandomTemporalDelete:
    def __init__(self, T_remain: int, batch_first: bool):
        self.T_remain = T_remain
        self.batch_first = batch_first

    def __call__(self, x_seq: jnp.ndarray, key: jax.Array) -> jnp.ndarray:
        return random_temporal_delete(x_seq, self.T_remain, self.batch_first, key)


if __name__ == "__main__":
    key = jax.random.PRNGKey(0)
    k_data, k_choice1, k_choice2, k_choice3 = jax.random.split(key, 4)

    # small shapes: N=2, T=8, C=4, H=W=16
    N, T, C, H, W = 2, 8, 4, 16, 16
    T_remain = 5

    # ---- batch_first=True: x[N, T, C, H, W] (f32) ----
    x_bf = jax.random.normal(k_data, (N, T, C, H, W), dtype=jnp.float32)
    mod_bf = RandomTemporalDelete(T_remain, batch_first=True)
    y_bf = jax.block_until_ready(mod_bf(x_bf, k_choice1))
    assert y_bf.shape == (N, T_remain, C, H, W)
    sec_ref1 = jnp.sort(jax.random.choice(k_choice1, T, shape=(T_remain,), replace=False))
    np.testing.assert_array_equal(np.asarray(y_bf), np.asarray(x_bf[:, sec_ref1]))

    # ---- batch_first=False: x[T, N, C, H, W] (f32) ----
    x_tf = jnp.moveaxis(x_bf, 1, 0)  # (test-data construction only, not in the op path)
    mod_tf = RandomTemporalDelete(T_remain, batch_first=False)
    y_tf = jax.block_until_ready(mod_tf(x_tf, k_choice2))
    assert y_tf.shape == (T_remain, N, C, H, W)
    sec_ref2 = jnp.sort(jax.random.choice(k_choice2, T, shape=(T_remain,), replace=False))
    np.testing.assert_array_equal(np.asarray(y_tf), np.asarray(x_tf[sec_ref2]))

    # ---- batch_first=True with a narrow dtype (bf16): DMA path is dtype-agnostic ----
    x_bf16 = jax.random.normal(k_data, (N, T, C, H, W), dtype=jnp.bfloat16)
    y_bf16 = jax.block_until_ready(mod_bf(x_bf16, k_choice3))
    assert y_bf16.shape == (N, T_remain, C, H, W)
    sec_ref3 = jnp.sort(jax.random.choice(k_choice3, T, shape=(T_remain,), replace=False))
    np.testing.assert_array_equal(
        np.asarray(y_bf16.astype(jnp.float32)),
        np.asarray(x_bf16[:, sec_ref3].astype(jnp.float32)),
    )

    print("KERNEL_OK")
</pallas_src>

<mosaic_0001>
module attributes {stable_mosaic.version = 11 : i64} {
  func.func @kernel(%arg0: i32, %arg1: memref<5xi32, #tpu.memory_space<smem>>, %arg2: memref<2x8x1024xf32, #tpu.memory_space<any>>, %arg3: memref<2x5x1024xf32, #tpu.memory_space<any>>, %arg4: memref<5x!tpu.dma_semaphore, #tpu.memory_space<semaphore_mem>>) attributes {dimension_semantics = [#tpu.dimension_semantics<arbitrary>], iteration_bounds = array<i64: 1>, scalar_prefetch = 1 : i64, scratch_operands = 1 : i64, tpu.core_type = #tpu.core_type<tc>, window_params = [{}, {}]} {
    %c0 = arith.constant 0 : index
    %0 = memref.load %arg1[%c0] : memref<5xi32, #tpu.memory_space<smem>>
    %c0_i32 = arith.constant 0 : i32
    %c0_i32_0 = arith.constant 0 : i32
    %c0_i32_1 = arith.constant 0 : i32
    %1 = tpu.memref_slice %arg2[%c0_i32_0, %0, %c0_i32_1] : memref<2x8x1024xf32, #tpu.memory_space<any>> -> memref<2x1x1024xf32, #tpu.memory_space<any>>
    %c0_i32_2 = arith.constant 0 : i32
    %c0_i32_3 = arith.constant 0 : i32
    %c0_i32_4 = arith.constant 0 : i32
    %2 = tpu.memref_slice %arg3[%c0_i32_2, %c0_i32_3, %c0_i32_4] : memref<2x5x1024xf32, #tpu.memory_space<any>> -> memref<2x1x1024xf32, #tpu.memory_space<any>>
    %3 = tpu.memref_slice %arg4[%c0_i32] : memref<5x!tpu.dma_semaphore, #tpu.memory_space<semaphore_mem>> -> memref<1x!tpu.dma_semaphore, #tpu.memory_space<semaphore_mem>>
    %4 = tpu.memref_squeeze %3 : memref<1x!tpu.dma_semaphore, #tpu.memory_space<semaphore_mem>> -> memref<!tpu.dma_semaphore, #tpu.memory_space<semaphore_mem>>
    tpu.enqueue_dma source(%1 : memref<2x1x1024xf32, #tpu.memory_space<any>>) target(%2 : memref<2x1x1024xf32, #tpu.memory_space<any>>) target_semaphore(%4 : memref<!tpu.dma_semaphore, #tpu.memory_space<semaphore_mem>>)
    %c1 = arith.constant 1 : index
    %5 = memref.load %arg1[%c1] : memref<5xi32, #tpu.memory_space<smem>>
    %c1_i32 = arith.constant 1 : i32
    %c0_i32_5 = arith.constant 0 : i32
    %c0_i32_6 = arith.constant 0 : i32
    %6 = tpu.memref_slice %arg2[%c0_i32_5, %5, %c0_i32_6] : memref<2x8x1024xf32, #tpu.memory_space<any>> -> memref<2x1x1024xf32, #tpu.memory_space<any>>
    %c0_i32_7 = arith.constant 0 : i32
    %c1_i32_8 = arith.constant 1 : i32
    %c0_i32_9 = arith.constant 0 : i32
    %7 = tpu.memref_slice %arg3[%c0_i32_7, %c1_i32_8, %c0_i32_9] : memref<2x5x1024xf32, #tpu.memory_space<any>> -> memref<2x1x1024xf32, #tpu.memory_space<any>>
    %8 = tpu.memref_slice %arg4[%c1_i32] : memref<5x!tpu.dma_semaphore, #tpu.memory_space<semaphore_mem>> -> memref<1x!tpu.dma_semaphore, #tpu.memory_space<semaphore_mem>>
    %9 = tpu.memref_squeeze %8 : memref<1x!tpu.dma_semaphore, #tpu.memory_space<semaphore_mem>> -> memref<!tpu.dma_semaphore, #tpu.memory_space<semaphore_mem>>
    tpu.enqueue_dma source(%6 : memref<2x1x1024xf32, #tpu.memory_space<any>>) target(%7 : memref<2x1x1024xf32, #tpu.memory_space<any>>) target_semaphore(%9 : memref<!tpu.dma_semaphore, #tpu.memory_space<semaphore_mem>>)
    %c2 = arith.constant 2 : index
    %10 = memref.load %arg1[%c2] : memref<5xi32, #tpu.memory_space<smem>>
    %c2_i32 = arith.constant 2 : i32
    %c0_i32_10 = arith.constant 0 : i32
    %c0_i32_11 = arith.constant 0 : i32
    %11 = tpu.memref_slice %arg2[%c0_i32_10, %10, %c0_i32_11] : memref<2x8x1024xf32, #tpu.memory_space<any>> -> memref<2x1x1024xf32, #tpu.memory_space<any>>
    %c0_i32_12 = arith.constant 0 : i32
    %c2_i32_13 = arith.constant 2 : i32
    %c0_i32_14 = arith.constant 0 : i32
    %12 = tpu.memref_slice %arg3[%c0_i32_12, %c2_i32_13, %c0_i32_14] : memref<2x5x1024xf32, #tpu.memory_space<any>> -> memref<2x1x1024xf32, #tpu.memory_space<any>>
    %13 = tpu.memref_slice %arg4[%c2_i32] : memref<5x!tpu.dma_semaphore, #tpu.memory_space<semaphore_mem>> -> memref<1x!tpu.dma_semaphore, #tpu.memory_space<semaphore_mem>>
    %14 = tpu.memref_squeeze %13 : memref<1x!tpu.dma_semaphore, #tpu.memory_space<semaphore_mem>> -> memref<!tpu.dma_semaphore, #tpu.memory_space<semaphore_mem>>
    tpu.enqueue_dma source(%11 : memref<2x1x1024xf32, #tpu.memory_space<any>>) target(%12 : memref<2x1x1024xf32, #tpu.memory_space<any>>) target_semaphore(%14 : memref<!tpu.dma_semaphore, #tpu.memory_space<semaphore_mem>>)
    %c3 = arith.constant 3 : index
    %15 = memref.load %arg1[%c3] : memref<5xi32, #tpu.memory_space<smem>>
    %c3_i32 = arith.constant 3 : i32
    %c0_i32_15 = arith.constant 0 : i32
    %c0_i32_16 = arith.constant 0 : i32
    %16 = tpu.memref_slice %arg2[%c0_i32_15, %15, %c0_i32_16] : memref<2x8x1024xf32, #tpu.memory_space<any>> -> memref<2x1x1024xf32, #tpu.memory_space<any>>
    %c0_i32_17 = arith.constant 0 : i32
    %c3_i32_18 = arith.constant 3 : i32
    %c0_i32_19 = arith.constant 0 : i32
    %17 = tpu.memref_slice %arg3[%c0_i32_17, %c3_i32_18, %c0_i32_19] : memref<2x5x1024xf32, #tpu.memory_space<any>> -> memref<2x1x1024xf32, #tpu.memory_space<any>>
    %18 = tpu.memref_slice %arg4[%c3_i32] : memref<5x!tpu.dma_semaphore, #tpu.memory_space<semaphore_mem>> -> memref<1x!tpu.dma_semaphore, #tpu.memory_space<semaphore_mem>>
    %19 = tpu.memref_squeeze %18 : memref<1x!tpu.dma_semaphore, #tpu.memory_space<semaphore_mem>> -> memref<!tpu.dma_semaphore, #tpu.memory_space<semaphore_mem>>
    tpu.enqueue_dma source(%16 : memref<2x1x1024xf32, #tpu.memory_space<any>>) target(%17 : memref<2x1x1024xf32, #tpu.memory_space<any>>) target_semaphore(%19 : memref<!tpu.dma_semaphore, #tpu.memory_space<semaphore_mem>>)
    %c4 = arith.constant 4 : index
    %20 = memref.load %arg1[%c4] : memref<5xi32, #tpu.memory_space<smem>>
    %c4_i32 = arith.constant 4 : i32
    %c0_i32_20 = arith.constant 0 : i32
    %c0_i32_21 = arith.constant 0 : i32
    %21 = tpu.memref_slice %arg2[%c0_i32_20, %20, %c0_i32_21] : memref<2x8x1024xf32, #tpu.memory_space<any>> -> memref<2x1x1024xf32, #tpu.memory_space<any>>
    %c0_i32_22 = arith.constant 0 : i32
    %c4_i32_23 = arith.constant 4 : i32
    %c0_i32_24 = arith.constant 0 : i32
    %22 = tpu.memref_slice %arg3[%c0_i32_22, %c4_i32_23, %c0_i32_24] : memref<2x5x1024xf32, #tpu.memory_space<any>> -> memref<2x1x1024xf32, #tpu.memory_space<any>>
    %23 = tpu.memref_slice %arg4[%c4_i32] : memref<5x!tpu.dma_semaphore, #tpu.memory_space<semaphore_mem>> -> memref<1x!tpu.dma_semaphore, #tpu.memory_space<semaphore_mem>>
    %24 = tpu.memref_squeeze %23 : memref<1x!tpu.dma_semaphore, #tpu.memory_space<semaphore_mem>> -> memref<!tpu.dma_semaphore, #tpu.memory_space<semaphore_mem>>
    tpu.enqueue_dma source(%21 : memref<2x1x1024xf32, #tpu.memory_space<any>>) target(%22 : memref<2x1x1024xf32, #tpu.memory_space<any>>) target_semaphore(%24 : memref<!tpu.dma_semaphore, #tpu.memory_space<semaphore_mem>>)
    %c0_i32_25 = arith.constant 0 : i32
    %c0_i32_26 = arith.constant 0 : i32
    %25 = arith.addi %c0_i32_25, %c0_i32_26 : i32
    %c1_i32_27 = arith.constant 1 : i32
    scf.for %arg5 = %c0_i32_25 to %25 step %c1_i32_27  : i32 {
      %c1_i32_64 = arith.constant 1 : i32
      %46 = arith.muli %arg5, %c1_i32_64 : i32
      %c5_i32 = arith.constant 5 : i32
      %47 = arith.addi %c5_i32, %46 : i32
      %c5_i32_65 = arith.constant 5 : i32
      %c0_i32_66 = arith.constant 0 : i32
      %48 = arith.cmpi eq, %c5_i32_65, %c0_i32_66 : i32
      %c1_i32_67 = arith.constant 1 : i32
      %49 = arith.select %48, %c1_i32_67, %c5_i32_65 : i32
      %50 = arith.remsi %47, %49 : i32
      %c0_i32_68 = arith.constant 0 : i32
      %51 = arith.cmpi ne, %50, %c0_i32_68 : i32
      %c0_i32_69 = arith.constant 0 : i32
      %52 = arith.cmpi slt, %50, %c0_i32_69 : i32
      %c0_i32_70 = arith.constant 0 : i32
      %53 = arith.cmpi slt, %49, %c0_i32_70 : i32
      %54 = arith.xori %52, %53 : i1
      %55 = arith.andi %54, %51 : i1
      %56 = arith.addi %50, %49 : i32
      %57 = arith.select %55, %56, %50 : i32
      %c0_i32_71 = arith.constant 0 : i32
      %c0_i32_72 = arith.constant 0 : i32
      %c0_i32_73 = arith.constant 0 : i32
      %58 = tpu.memref_slice %arg2[%c0_i32_71, %c0_i32_72, %c0_i32_73] : memref<2x8x1024xf32, #tpu.memory_space<any>> -> memref<2x1x1024xf32, #tpu.memory_space<any>>
      %c0_i32_74 = arith.constant 0 : i32
      %c0_i32_75 = arith.constant 0 : i32
      %c0_i32_76 = arith.constant 0 : i32
      %59 = tpu.memref_slice %arg3[%c0_i32_74, %c0_i32_75, %c0_i32_76] : memref<2x5x1024xf32, #tpu.memory_space<any>> -> memref<2x1x1024xf32, #tpu.memory_space<any>>
      %60 = tpu.memref_slice %arg4[%57] : memref<5x!tpu.dma_semaphore, #tpu.memory_space<semaphore_mem>> -> memref<1x!tpu.dma_semaphore, #tpu.memory_space<semaphore_mem>>
      %61 = tpu.memref_squeeze %60 : memref<1x!tpu.dma_semaphore, #tpu.memory_space<semaphore_mem>> -> memref<!tpu.dma_semaphore, #tpu.memory_space<semaphore_mem>>
      tpu.wait_dma2 semaphore(%61 : memref<!tpu.dma_semaphore, #tpu.memory_space<semaphore_mem>>) src(%58 : memref<2x1x1024xf32, #tpu.memory_space<any>>) dst(%59 : memref<2x1x1024xf32, #tpu.memory_space<any>>)
      %62 = arith.index_cast %47 : i32 to index
      %63 = memref.load %arg1[%62] : memref<5xi32, #tpu.memory_space<smem>>
      %c0_i32_77 = arith.constant 0 : i32
      %c0_i32_78 = arith.constant 0 : i32
      %64 = tpu.memref_slice %arg2[%c0_i32_77, %63, %c0_i32_78] : memref<2x8x1024xf32, #tpu.memory_space<any>> -> memref<2x1x1024xf32, #tpu.memory_space<any>>
      %c0_i32_79 = arith.constant 0 : i32
      %c0_i32_80 = arith.constant 0 : i32
      %65 = tpu.memref_slice %arg3[%c0_i32_79, %47, %c0_i32_80] : memref<2x5x1024xf32, #tpu.memory_space<any>> -> memref<2x1x1024xf32, #tpu.memory_space<any>>
      %66 = tpu.memref_slice %arg4[%57] : memref<5x!tpu.dma_semaphore, #tpu.memory_space<semaphore_mem>> -> memref<1x!tpu.dma_semaphore, #tpu.memory_space<semaphore_mem>>
      %67 = tpu.memref_squeeze %66 : memref<1x!tpu.dma_semaphore, #tpu.memory_space<semaphore_mem>> -> memref<!tpu.dma_semaphore, #tpu.memory_space<semaphore_mem>>
      tpu.enqueue_dma source(%64 : memref<2x1x1024xf32, #tpu.memory_space<any>>) target(%65 : memref<2x1x1024xf32, #tpu.memory_space<any>>) target_semaphore(%67 : memref<!tpu.dma_semaphore, #tpu.memory_space<semaphore_mem>>)
    }
    %c0_i32_28 = arith.constant 0 : i32
    %c0_i32_29 = arith.constant 0 : i32
    %c0_i32_30 = arith.constant 0 : i32
    %c0_i32_31 = arith.constant 0 : i32
    %c0_i32_32 = arith.constant 0 : i32
    %26 = tpu.memref_slice %arg2[%c0_i32_30, %c0_i32_31, %c0_i32_32] : memref<2x8x1024xf32, #tpu.memory_space<any>> -> memref<2x1x1024xf32, #tpu.memory_space<any>>
    %c0_i32_33 = arith.constant 0 : i32
    %c0_i32_34 = arith.constant 0 : i32
    %c0_i32_35 = arith.constant 0 : i32
    %27 = tpu.memref_slice %arg3[%c0_i32_33, %c0_i32_34, %c0_i32_35] : memref<2x5x1024xf32, #tpu.memory_space<any>> -> memref<2x1x1024xf32, #tpu.memory_space<any>>
    %28 = tpu.memref_slice %arg4[%c0_i32_29] : memref<5x!tpu.dma_semaphore, #tpu.memory_space<semaphore_mem>> -> memref<1x!tpu.dma_semaphore, #tpu.memory_space<semaphore_mem>>
    %29 = tpu.memref_squeeze %28 : memref<1x!tpu.dma_semaphore, #tpu.memory_space<semaphore_mem>> -> memref<!tpu.dma_semaphore, #tpu.memory_space<semaphore_mem>>
    tpu.wait_dma2 semaphore(%29 : memref<!tpu.dma_semaphore, #tpu.memory_space<semaphore_mem>>) src(%26 : memref<2x1x1024xf32, #tpu.memory_space<any>>) dst(%27 : memref<2x1x1024xf32, #tpu.memory_space<any>>)
    %c1_i32_36 = arith.constant 1 : i32
    %c0_i32_37 = arith.constant 0 : i32
    %c0_i32_38 = arith.constant 0 : i32
    %c0_i32_39 = arith.constant 0 : i32
    %30 = tpu.memref_slice %arg2[%c0_i32_37, %c0_i32_38, %c0_i32_39] : memref<2x8x1024xf32, #tpu.memory_space<any>> -> memref<2x1x1024xf32, #tpu.memory_space<any>>
    %c0_i32_40 = arith.constant 0 : i32
    %c0_i32_41 = arith.constant 0 : i32
    %c0_i32_42 = arith.constant 0 : i32
    %31 = tpu.memref_slice %arg3[%c0_i32_40, %c0_i32_41, %c0_i32_42] : memref<2x5x1024xf32, #tpu.memory_space<any>> -> memref<2x1x1024xf32, #tpu.memory_space<any>>
    %32 = tpu.memref_slice %arg4[%c1_i32_36] : memref<5x!tpu.dma_semaphore, #tpu.memory_space<semaphore_mem>> -> memref<1x!tpu.dma_semaphore, #tpu.memory_space<semaphore_mem>>
    %33 = tpu.memref_squeeze %32 : memref<1x!tpu.dma_semaphore, #tpu.memory_space<semaphore_mem>> -> memref<!tpu.dma_semaphore, #tpu.memory_space<semaphore_mem>>
    tpu.wait_dma2 semaphore(%33 : memref<!tpu.dma_semaphore, #tpu.memory_space<semaphore_mem>>) src(%30 : memref<2x1x1024xf32, #tpu.memory_space<any>>) dst(%31 : memref<2x1x1024xf32, #tpu.memory_space<any>>)
    %c2_i32_43 = arith.constant 2 : i32
    %c0_i32_44 = arith.constant 0 : i32
    %c0_i32_45 = arith.constant 0 : i32
    %c0_i32_46 = arith.constant 0 : i32
    %34 = tpu.memref_slice %arg2[%c0_i32_44, %c0_i32_45, %c0_i32_46] : memref<2x8x1024xf32, #tpu.memory_space<any>> -> memref<2x1x1024xf32, #tpu.memory_space<any>>
    %c0_i32_47 = arith.constant 0 : i32
    %c0_i32_48 = arith.constant 0 : i32
    %c0_i32_49 = arith.constant 0 : i32
    %35 = tpu.memref_slice %arg3[%c0_i32_47, %c0_i32_48, %c0_i32_49] : memref<2x5x1024xf32, #tpu.memory_space<any>> -> memref<2x1x1024xf32, #tpu.memory_space<any>>
    %36 = tpu.memref_slice %arg4[%c2_i32_43] : memref<5x!tpu.dma_semaphore, #tpu.memory_space<semaphore_mem>> -> memref<1x!tpu.dma_semaphore, #tpu.memory_space<semaphore_mem>>
    %37 = tpu.memref_squeeze %36 : memref<1x!tpu.dma_semaphore, #tpu.memory_space<semaphore_mem>> -> memref<!tpu.dma_semaphore, #tpu.memory_space<semaphore_mem>>
    tpu.wait_dma2 semaphore(%37 : memref<!tpu.dma_semaphore, #tpu.memory_space<semaphore_mem>>) src(%34 : memref<2x1x1024xf32, #tpu.memory_space<any>>) dst(%35 : memref<2x1x1024xf32, #tpu.memory_space<any>>)
    %c3_i32_50 = arith.constant 3 : i32
    %c0_i32_51 = arith.constant 0 : i32
    %c0_i32_52 = arith.constant 0 : i32
    %c0_i32_53 = arith.constant 0 : i32
    %38 = tpu.memref_slice %arg2[%c0_i32_51, %c0_i32_52, %c0_i32_53] : memref<2x8x1024xf32, #tpu.memory_space<any>> -> memref<2x1x1024xf32, #tpu.memory_space<any>>
    %c0_i32_54 = arith.constant 0 : i32
    %c0_i32_55 = arith.constant 0 : i32
    %c0_i32_56 = arith.constant 0 : i32
    %39 = tpu.memref_slice %arg3[%c0_i32_54, %c0_i32_55, %c0_i32_56] : memref<2x5x1024xf32, #tpu.memory_space<any>> -> memref<2x1x1024xf32, #tpu.memory_space<any>>
    %40 = tpu.memref_slice %arg4[%c3_i32_50] : memref<5x!tpu.dma_semaphore, #tpu.memory_space<semaphore_mem>> -> memref<1x!tpu.dma_semaphore, #tpu.memory_space<semaphore_mem>>
    %41 = tpu.memref_squeeze %40 : memref<1x!tpu.dma_semaphore, #tpu.memory_space<semaphore_mem>> -> memref<!tpu.dma_semaphore, #tpu.memory_space<semaphore_mem>>
    tpu.wait_dma2 semaphore(%41 : memref<!tpu.dma_semaphore, #tpu.memory_space<semaphore_mem>>) src(%38 : memref<2x1x1024xf32, #tpu.memory_space<any>>) dst(%39 : memref<2x1x1024xf32, #tpu.memory_space<any>>)
    %c4_i32_57 = arith.constant 4 : i32
    %c0_i32_58 = arith.constant 0 : i32
    %c0_i32_59 = arith.constant 0 : i32
    %c0_i32_60 = arith.constant 0 : i32
    %42 = tpu.memref_slice %arg2[%c0_i32_58, %c0_i32_59, %c0_i32_60] : memref<2x8x1024xf32, #tpu.memory_space<any>> -> memref<2x1x1024xf32, #tpu.memory_space<any>>
    %c0_i32_61 = arith.constant 0 : i32
    %c0_i32_62 = arith.constant 0 : i32
    %c0_i32_63 = arith.constant 0 : i32
    %43 = tpu.memref_slice %arg3[%c0_i32_61, %c0_i32_62, %c0_i32_63] : memref<2x5x1024xf32, #tpu.memory_space<any>> -> memref<2x1x1024xf32, #tpu.memory_space<any>>
    %44 = tpu.memref_slice %arg4[%c4_i32_57] : memref<5x!tpu.dma_semaphore, #tpu.memory_space<semaphore_mem>> -> memref<1x!tpu.dma_semaphore, #tpu.memory_space<semaphore_mem>>
    %45 = tpu.memref_squeeze %44 : memref<1x!tpu.dma_semaphore, #tpu.memory_space<semaphore_mem>> -> memref<!tpu.dma_semaphore, #tpu.memory_space<semaphore_mem>>
    tpu.wait_dma2 semaphore(%45 : memref<!tpu.dma_semaphore, #tpu.memory_space<semaphore_mem>>) src(%42 : memref<2x1x1024xf32, #tpu.memory_space<any>>) dst(%43 : memref<2x1x1024xf32, #tpu.memory_space<any>>)
    return
  }
}

</mosaic_0001>

<bundles_post_ra>
// kernel: tpu_custom_call.1
= control target key start
LH: loop header
LB: loop body
LE: loop exit
PB: predicated region body
PF: predicated region fallthrough
CT: control target
= control target key end

     0   :  { %s297_s9 = smov [#allocation4]   ;;  %s431_s0 = inlined_call_operand.hbm [shape: s32[5], index: 0, kind: input, shape index: {}]   ;;  %s432_s1 = inlined_call_operand.hbm [shape: f32[2,8,1024], index: 1, kind: input, shape index: {}]   ;;  %s433_s2 = inlined_call_operand.vmem [shape: f32[2,5,1024], index: 2, kind: output, shape index: {}]  }
   0x1   :  { %8 = dma.hbm_to_smem %s431_s0, 16, %s297_s9, [#allocation3] }
   0x2   :  { %285 = dma.done.wait [#allocation3], 16 }
   0x3   :  { %286 = vsyncadd [#allocation3], 4294967280 }
   0x4   :  { %10 = sfence }
   0x5   :  { %s11_s12 = sld [smem:[#allocation4]]  ;;  %s19_s15 = sshll.u32 %s433_s2, 4  ;;  %s321_s15 = int_to_ptr.vmem [resolvable:$true] %s19_s15 }
   0x6   :  { %s323_s16 = sld [smem:[#allocation4 + $0x1]]  ;;  %s30_s19 = scalar_lea.vmem %s433_s2, 1 }
   0x7   :  { %s328_s20 = sld [smem:[#allocation4 + $0x2]]  ;;  %s33_s0 = sshll.u32 %s30_s19, 4  ;;  %s333_s0 = int_to_ptr.vmem [resolvable:$true] %s33_s0 }
   0x8   :  { %s44_s23 = scalar_lea.vmem %s433_s2, 2  ;;  %s345_s11 = scalar_lea.hbm %s432_s1, 2048 }
   0x9   :  { %s47_s24 = sshll.u32 %s44_s23, 4  ;;  %s335_s24 = int_to_ptr.vmem [resolvable:$true] %s47_s24 }
   0xb   :  { %s12_s25 = sshrl.u32 %s11_s12, 3  ;;  %s13_s26 = sand.u32 7, %s11_s12  }
   0xc   :  { %s145_s27 = sshll.u32 %s12_s25, 6  ;;  %s24_s29 = sshrl.u32 %s323_s16, 3 }
   0xd   :  { %s15_s28 = sadd.s32 %s145_s27, %s13_s26  ;;  %s25_s3 = sand.u32 7, %s323_s16  }
   0xe   :  { %s146_s30 = sshll.u32 %s15_s28, 4  ;;  %s148_s7 = sshll.u32 %s24_s29, 6 }
   0xf   :  { %s17_s6 = scalar_lea.hbm %s432_s1, %s146_s30 }
  0x10   :  { %s175_s8 = scalar_lea.hbm %s17_s6, 256  ;;  %p178_p1 = scmp.lt.s32.totalorder %s17_s6, %s432_s1 }
  0x11   :  { %p176_p0 = scmp.ne.s32.totalorder %s17_s6, %s175_s8  ;;  %p179_p2 = scmp.lt.s32.totalorder %s345_s11, %s175_s8 }
  0x13   :  { %p180_p3 = por %p179_p2, %p178_p1 }
  0x15   :  { %p181_p4 = pnand %p180_p3, %p176_p0 }
  0x17   :  { %184 = shalt.err (!%p181_p4)  }
  0x18   :  { %s185_s14 = scalar_lea.vmem %s321_s15, 256  ;;  %s354_s16 = scalar_lea.vmem %s321_s15, 2048 }
  0x19   :  { %p186_p5 = scmp.ne.s32.totalorder %s321_s15, %s185_s14  ;;  %p190_p6 = scmp.lt.s32.totalorder %s321_s15, %s321_s15 }
  0x1a   :  { %p191_p7 = scmp.lt.s32.totalorder %s354_s16, %s185_s14 }
  0x1c   :  { %p192_p8 = por %p191_p7, %p190_p6 }
  0x1e   :  { %p193_p9 = pnand %p192_p8, %p186_p5 }
  0x20   :  { %196 = shalt.err (!%p193_p9)  }
  0x21   :  { %s298_s17 = smov 128   ;;  %s299_s18 = smov 1  }
  0x22   :  { %22 = dma.hbm_to_vmem [thread:$0]  %s17_s6, 256, %s321_s15, [#allocation2], %s298_s17, %s298_s17, %s299_s18 }
  0x23   :  { %s27_s19 = sadd.s32 %s148_s7, %s25_s3  ;;  %s38_s21 = sshrl.u32 %s328_s20, 3 }
  0x24   :  { %s149_s22 = sshll.u32 %s27_s19, 4  ;;  %s39_s23 = sand.u32 7, %s328_s20  }
  0x25   :  { %s29_s27 = scalar_lea.hbm %s432_s1, %s149_s22  ;;  %s151_s28 = sshll.u32 %s38_s21, 6 }
  0x26   :  { %s197_s29 = scalar_lea.hbm %s29_s27, 256  ;;  %p200_p11 = scmp.lt.s32.totalorder %s29_s27, %s432_s1 }
  0x27   :  { %p198_p10 = scmp.ne.s32.totalorder %s29_s27, %s197_s29  ;;  %p201_p12 = scmp.lt.s32.totalorder %s345_s11, %s197_s29 }
  0x29   :  { %p202_p13 = por %p201_p12, %p200_p11 }
  0x2b   :  { %p203_p0 = pnand %p202_p13, %p198_p10 }
  0x2d   :  { %206 = shalt.err (!%p203_p0)  }
  0x2e   :  { %s207_s20 = scalar_lea.vmem %s333_s0, 256  ;;  %p212_p2 = scmp.lt.s32.totalorder %s333_s0, %s321_s15 }
  0x2f   :  { %p208_p1 = scmp.ne.s32.totalorder %s333_s0, %s207_s20  ;;  %p213_p3 = scmp.lt.s32.totalorder %s354_s16, %s207_s20 }
  0x31   :  { %p214_p4 = por %p213_p3, %p212_p2 }
  0x33   :  { %p215_p5 = pnand %p214_p4, %p208_p1 }
  0x35   :  { %218 = shalt.err (!%p215_p5)  }
  0x36   :  { %36 = dma.hbm_to_vmem [thread:$0]  %s29_s27, 256, %s333_s0, [#allocation2 + $0x1], %s298_s17, %s298_s17, %s299_s18 }
  0x37   :  { %s41_s3 = sadd.s32 %s151_s28, %s39_s23  ;;  %s153_s5 = sld [smem:[#allocation4 + $0x3]] }
  0x38   :  { %s152_s6 = sshll.u32 %s41_s3, 4  ;;  %s58_s13 = scalar_lea.vmem %s433_s2, 3 }
  0x39   :  { %s43_s9 = scalar_lea.hbm %s432_s1, %s152_s6 }
  0x3a   :  { %s219_s14 = scalar_lea.hbm %s43_s9, 256  ;;  %p222_p7 = scmp.lt.s32.totalorder %s43_s9, %s432_s1 }
  0x3b   :  { %p220_p6 = scmp.ne.s32.totalorder %s43_s9, %s219_s14  ;;  %p223_p8 = scmp.lt.s32.totalorder %s345_s11, %s219_s14 }
  0x3d   :  { %p224_p9 = por %p223_p8, %p222_p7 }
  0x3f   :  { %p225_p10 = pnand %p224_p9, %p220_p6 }
  0x41   :  { %228 = shalt.err (!%p225_p10)  }
  0x42   :  { %s229_s0 = scalar_lea.vmem %s335_s24, 256  ;;  %p234_p12 = scmp.lt.s32.totalorder %s335_s24, %s321_s15 }
  0x43   :  { %p230_p11 = scmp.ne.s32.totalorder %s335_s24, %s229_s0  ;;  %p235_p13 = scmp.lt.s32.totalorder %s354_s16, %s229_s0 }
  0x45   :  { %p236_p0 = por %p235_p13, %p234_p12 }
  0x47   :  { %p237_p1 = pnand %p236_p0, %p230_p11 }
  0x49   :  { %240 = shalt.err (!%p237_p1)  }
  0x4a   :  { %50 = dma.hbm_to_vmem [thread:$0]  %s43_s9, 256, %s335_s24, [#allocation2 + $0x2], %s298_s17, %s298_s17, %s299_s18 }
  0x4b   :  { %s400_s22 = sld [smem:[#allocation4 + $0x4]]  ;;  %s61_s23 = sshll.u32 %s58_s13, 4  ;;  %s62_s23 = int_to_ptr.vmem [resolvable:$true] %s61_s23 }
  0x4c   :  { %s72_s27 = scalar_lea.vmem %s433_s2, 4  ;;  %s52_s28 = sshrl.u32 %s153_s5, 3 }
  0x4d   :  { %s53_s29 = sand.u32 7, %s153_s5   ;;  %s154_s30 = sshll.u32 %s52_s28, 6 }
  0x4e   :  { %s55_s4 = sadd.s32 %s154_s30, %s53_s29  ;;  %s75_s3 = sshll.u32 %s72_s27, 4  ;;  %s76_s3 = int_to_ptr.vmem [resolvable:$true] %s75_s3 }
  0x4f   :  { %s155_s20 = sshll.u32 %s55_s4, 4 }
  0x50   :  { %s57_s24 = scalar_lea.hbm %s432_s1, %s155_s20 }
  0x51   :  { %s66_s8 = sshrl.u32 %s400_s22, 3  ;;  %s241_s9 = scalar_lea.hbm %s57_s24, 256 }
  0x52   :  { %p242_p2 = scmp.ne.s32.totalorder %s57_s24, %s241_s9  ;;  %p244_p3 = scmp.lt.s32.totalorder %s57_s24, %s432_s1 }
  0x53   :  { %p245_p4 = scmp.lt.s32.totalorder %s345_s11, %s241_s9 }
  0x55   :  { %p246_p5 = por %p245_p4, %p244_p3 }
  0x57   :  { %p247_p6 = pnand %p246_p5, %p242_p2 }
  0x59   :  { %250 = shalt.err (!%p247_p6)  }
  0x5a   :  { %s251_s2 = scalar_lea.vmem %s62_s23, 256  ;;  %p256_p8 = scmp.lt.s32.totalorder %s62_s23, %s321_s15 }
  0x5b   :  { %p252_p7 = scmp.ne.s32.totalorder %s62_s23, %s251_s2  ;;  %p257_p9 = scmp.lt.s32.totalorder %s354_s16, %s251_s2 }
  0x5d   :  { %p258_p10 = por %p257_p9, %p256_p8 }
  0x5f   :  { %p259_p11 = pnand %p258_p10, %p252_p7 }
  0x61   :  { %262 = shalt.err (!%p259_p11)  }
  0x62   :  { %64 = dma.hbm_to_vmem [thread:$0]  %s57_s24, 256, %s62_s23, [#allocation2 + $0x3], %s298_s17, %s298_s17, %s299_s18 }
  0x63   :  { %s67_s5 = sand.u32 7, %s400_s22   ;;  %s157_s13 = sshll.u32 %s66_s8, 6 }
  0x64   :  { %s69_s14 = sadd.s32 %s157_s13, %s67_s5 }
  0x65   :  { %s158_s19 = sshll.u32 %s69_s14, 4 }
  0x66   :  { %s71_s25 = scalar_lea.hbm %s432_s1, %s158_s19 }
  0x67   :  { %s263_s26 = scalar_lea.hbm %s71_s25, 256  ;;  %p266_p13 = scmp.lt.s32.totalorder %s71_s25, %s432_s1 }
  0x68   :  { %p264_p12 = scmp.ne.s32.totalorder %s71_s25, %s263_s26  ;;  %p267_p0 = scmp.lt.s32.totalorder %s345_s11, %s263_s26 }
  0x6a   :  { %p268_p1 = por %p267_p0, %p266_p13 }
  0x6c   :  { %p269_p2 = pnand %p268_p1, %p264_p12 }
  0x6e   :  { %272 = shalt.err (!%p269_p2)  }
  0x6f   :  { %s273_s23 = scalar_lea.vmem %s76_s3, 256  ;;  %p278_p4 = scmp.lt.s32.totalorder %s76_s3, %s321_s15 }
  0x70   :  { %p274_p3 = scmp.ne.s32.totalorder %s76_s3, %s273_s23  ;;  %p279_p5 = scmp.lt.s32.totalorder %s354_s16, %s273_s23 }
  0x72   :  { %p280_p6 = por %p279_p5, %p278_p4 }
  0x74   :  { %p281_p7 = pnand %p280_p6, %p274_p3 }
  0x76   :  { %284 = shalt.err (!%p281_p7)  }
  0x77   :  { %78 = dma.hbm_to_vmem [thread:$0]  %s71_s25, 256, %s76_s3, [#allocation2 + $0x4], %s298_s17, %s298_s17, %s299_s18 }
  0x78   :  { %287 = dma.done.wait [#allocation2], 256 }
  0x79   :  { %288 = vsyncadd [#allocation2], 4294967040 }
  0x7a   :  { %289 = dma.done.wait [#allocation2 + $0x1], 256 }
  0x7b   :  { %290 = vsyncadd [#allocation2 + $0x1], 4294967040 }
  0x7c   :  { %291 = dma.done.wait [#allocation2 + $0x2], 256 }
  0x7d   :  { %292 = vsyncadd [#allocation2 + $0x2], 4294967040 }
  0x7e   :  { %293 = dma.done.wait [#allocation2 + $0x3], 256 }
  0x7f   :  { %294 = vsyncadd [#allocation2 + $0x3], 4294967040 }
  0x80   :  { %295 = dma.done.wait [#allocation2 + $0x4], 256 }
  0x81   :  { %296 = vsyncadd [#allocation2 + $0x4], 4294967040 }
  0x82   :  { %91 = vsyncmov [#allocation2] }
  0x85   :  { %s92_s1 = vpop.sfrf %91 }
  0x86   :  { %p159_p8 = scmp.ne.s32.totalorder %s92_s1, 0 }
  0x88   :  { %96 = shalt.err (%p159_p8)  }
  0x89   :  { %98 = vsyncmov [#allocation2 + $0x1] }
  0x8c   :  { %s99_s15 = vpop.sfrf %98 }
  0x8d   :  { %p160_p9 = scmp.ne.s32.totalorder %s99_s15, 0 }
  0x8f   :  { %103 = shalt.err (%p160_p9)  }
  0x90   :  { %105 = vsyncmov [#allocation2 + $0x2] }
  0x93   :  { %s106_s11 = vpop.sfrf %105 }
  0x94   :  { %p161_p10 = scmp.ne.s32.totalorder %s106_s11, 0 }
  0x96   :  { %110 = shalt.err (%p161_p10)  }
  0x97   :  { %112 = vsyncmov [#allocation2 + $0x3] }
  0x9a   :  { %s113_s16 = vpop.sfrf %112 }
  0x9b   :  { %p162_p11 = scmp.ne.s32.totalorder %s113_s16, 0 }
  0x9d   :  { %117 = shalt.err (%p162_p11)  }
  0x9e   :  { %119 = vsyncmov [#allocation2 + $0x4] }
  0xa1   :  { %s120_s17 = vpop.sfrf %119 }
  0xa2   :  { %p163_p12 = scmp.ne.s32.totalorder %s120_s17, 0 }
  0xa4   :  { %124 = shalt.err (%p163_p12)  }

</bundles_post_ra>
